<compile_context>
chip_gen: v6e
topology: v6e:2x2x1
jax: 0.10.0
libtpu: 0.0.40
codegen_flags: <defaults>
</compile_context>

<pallas_src>
import jax
import jax.numpy as jnp
from jax.experimental import pallas as pl
from jax.experimental.pallas import tpu as pltpu


def _round_up(x, m):
    return (x + m - 1) // m * m


def _triu_kernel(x_ref, wt_ref, b_ref, o_ref):
    # x_ref:  [tile_n, T_pad]  f32   flattened (batch*channel) rows x time lanes
    # wt_ref: [T_pad, T_pad]   bf16  transposed lower-triangular weight (out = x @ wt)
    # b_ref:  [1, T_pad]       f32   per-output-timestep bias
    # o_ref:  [tile_n, T_pad]  out dtype (f32 or bf16)
    x = x_ref[...].astype(jnp.bfloat16)  # in-kernel cast: free filler under DMA/MXU
    acc = jnp.dot(x, wt_ref[...], preferred_element_type=jnp.float32)
    o_ref[...] = (acc + b_ref[...]).astype(o_ref.dtype)


def _vmem_budget_bytes():
    """Generation-aware VMEM budget (leave headroom; v7x has 64 MiB/TC, v5e/v6e 128 MiB)."""
    try:
        cap = pltpu.get_tpu_info().vmem_capacity_bytes
    except Exception:
        cap = 64 * 1024 * 1024  # conservative fallback (v7x per-TC)
    return max(32 * 1024 * 1024, min(int(cap * 0.7), 100 * 1024 * 1024))


def triu_forward(x, w_tril, bias, *, tile_n_max=2048, out_dtype=None):
    """x: [B, C, T]; w_tril: [T, T] lower-triangular f32; bias: [T] f32.

    out_dtype defaults to x.dtype (f32 parity with the PyTorch module); pass
    jnp.bfloat16 in a bf16 pipeline to cut output HBM writeback in half.
    """
    B, C, T = x.shape
    N = B * C
    out_dtype = x.dtype if out_dtype is None else out_dtype

    # Lane-dense T axis.  The explicit zero pad is load-bearing: padded x lanes
    # must be exactly zero so they contribute nothing through the zero-padded
    # weight rows.  The N axis is NOT padded (partial last block is safe).
    t_pad = _round_up(T, 128)
    x2d = x.reshape(N, T)
    if t_pad != T:
        x2d = jnp.pad(x2d, ((0, 0), (0, t_pad - T)))

    # Transpose so the hot path is x @ wt; zero-pad so padded lanes contribute
    # nothing and padded output columns are exactly zero.  Weight/bias are tiny.
    wt = jnp.pad(w_tril.T, ((0, t_pad - T), (0, t_pad - T))).astype(jnp.bfloat16)
    b2d = jnp.pad(bias, (0, t_pad - T)).reshape(1, t_pad).astype(jnp.float32)

    # VMEM budgeting: 2x(x block) + 2x(out block) double-buffered, weight+bias
    # single-buffered and resident.
    budget = _vmem_budget_bytes()
    x_bytes = jnp.dtype(x.dtype).itemsize
    o_bytes = jnp.dtype(out_dtype).itemsize
    wt_bytes = t_pad * t_pad * 2 + t_pad * 4
    per_row = t_pad * 2 * (x_bytes + o_bytes)
    tile_n = max(8, ((budget - wt_bytes) // per_row) // 8 * 8)
    tile_n = min(tile_n, max(8, tile_n_max // 8 * 8))      # enforce sublane multiple
    tile_n = min(tile_n, _round_up(N, 8))                   # no 16x padding for tiny N
    if N >= 16:
        # Keep >= 2 grid steps so the "parallel" axis can shard across both
        # TensorCores on v7x (harmless extra step on single-TC v5e/v6e).
        tile_n = min(tile_n, _round_up(pl.cdiv(N, 2), 8))
    grid = (pl.cdiv(N, tile_n),)

    out2d = pl.pallas_call(
        _triu_kernel,
        out_shape=jax.ShapeDtypeStruct((N, t_pad), out_dtype),
        grid=grid,
        in_specs=[
            # x rows: tiled over the grid, f32 straight from HBM (no wrapper cast)
            pl.BlockSpec((tile_n, t_pad), lambda i: (i, 0)),
            # weight: grid-invariant -> single-buffered resident block
            pl.BlockSpec((t_pad, t_pad), lambda i: (0, 0),
                         pipeline_mode=pl.Buffered(1)),
            # bias: grid-invariant -> single-buffered resident block
            pl.BlockSpec((1, t_pad), lambda i: (0, 0),
                         pipeline_mode=pl.Buffered(1)),
        ],
        out_specs=pl.BlockSpec((tile_n, t_pad), lambda i: (i, 0)),
        compiler_params=pltpu.CompilerParams(
            dimension_semantics=("parallel",),   # row tiles independent -> megacore
            vmem_limit_bytes=budget,
        ),
    )(x2d, wt, b2d)

    if t_pad != T:
        out2d = out2d[:, :T]
    return out2d.reshape(B, C, T)


def init_triu_params(time_step, key):
    """Deterministic init mimicking nn.Linear(i+1, 1) per row.

    Returns lower-triangular weight [T, T] (row i = weights of triU[i], zero-padded)
    and bias [T].
    """
    rows = []
    biases = []
    for i in range(time_step):
        key, kw, kb = jax.random.split(key, 3)
        fan_in = i + 1
        bound = 1.0 / jnp.sqrt(jnp.float32(fan_in))
        w_i = jax.random.uniform(kw, (fan_in,), jnp.float32, -bound, bound)
        b_i = jax.random.uniform(kb, (), jnp.float32, -bound, bound)
        row = jnp.zeros((time_step,), jnp.float32).at[:fan_in].set(w_i)
        rows.append(row)
        biases.append(b_i)
    w_tril = jnp.stack(rows, axis=0)  # [T, T], lower-triangular
    bias = jnp.stack(biases, axis=0)  # [T]
    return w_tril, bias


def triu_reference(x, w_tril, bias):
    # Pure-JAX reference matching the PyTorch loop (elementwise mul + sum, f32).
    B, C, T = x.shape
    outs = []
    for i in range(T):
        outs.append(jnp.sum(x[:, :, : i + 1] * w_tril[i, : i + 1], axis=-1) + bias[i])
    return jnp.stack(outs, axis=-1)


if __name__ == "__main__":
    key = jax.random.PRNGKey(0)
    B, C, T = 2, 4, 8                       # small shapes: batch=2, channels=4, time_step=8
    k_x, k_p = jax.random.split(key)
    x = jax.random.normal(k_x, (B, C, T), jnp.float32)
    w_tril, bias = init_triu_params(T, k_p)

    out = triu_forward(x, w_tril, bias)     # default out_dtype = f32 (module parity)
    out = jax.block_until_ready(out)
    assert out.shape == (B, C, T), out.shape

    # Tight check against a reference using the same bf16 rounding of x and W
    # (kernel casts x/W to bf16 but accumulates in f32 -> agrees to ~1e-6).
    xq = x.astype(jnp.bfloat16).astype(jnp.float32)
    wq = w_tril.astype(jnp.bfloat16).astype(jnp.float32)
    ref_bf16_inputs = triu_reference(xq, wq, bias)
    assert jnp.allclose(out, ref_bf16_inputs, atol=1e-4, rtol=1e-4), \
        "mismatch vs bf16-rounded reference"

    # Loose sanity check against the full-f32 reference (bf16 quantization error only).
    ref_f32 = triu_reference(x, w_tril, bias)
    assert jnp.allclose(out, ref_f32, atol=3e-2, rtol=3e-2), "mismatch vs f32 reference"

    print("KERNEL_OK")
</pallas_src>

<mosaic_0001>
module attributes {stable_mosaic.version = 11 : i64} {
  func.func @_triu_kernel(%arg0: i32, %arg1: memref<8x128xf32, #tpu.memory_space<vmem>>, %arg2: memref<128x128xbf16, #tpu.memory_space<vmem>>, %arg3: memref<1x128xf32, #tpu.memory_space<vmem>>, %arg4: memref<8x128xf32, #tpu.memory_space<vmem>>) attributes {dimension_semantics = [#tpu.dimension_semantics<parallel>], iteration_bounds = array<i64: 1>, scalar_prefetch = 0 : i64, scratch_operands = 0 : i64, tpu.core_type = #tpu.core_type<tc>, window_params = [{transform_indices = @transform_0, window_bounds = array<i64: 8, 128>}, {pipeline_mode = #tpu.pipeline_mode<synchronous>, transform_indices = @transform_1, window_bounds = array<i64: 128, 128>}, {pipeline_mode = #tpu.pipeline_mode<synchronous>, transform_indices = @transform_2, window_bounds = array<i64: 1, 128>}, {transform_indices = @transform_3, window_bounds = array<i64: 8, 128>}]} {
    %c0 = arith.constant 0 : index
    %c0_0 = arith.constant 0 : index
    %0 = vector.load %arg1[%c0, %c0_0] : memref<8x128xf32, #tpu.memory_space<vmem>>, vector<8x128xf32>
    %1 = arith.truncf %0 : vector<8x128xf32> to vector<8x128xbf16>
    %c0_1 = arith.constant 0 : index
    %c0_2 = arith.constant 0 : index
    %2 = vector.load %arg2[%c0_1, %c0_2] : memref<128x128xbf16, #tpu.memory_space<vmem>>, vector<128x128xbf16>
    %cst = arith.constant dense<0.000000e+00> : vector<8x128xf32>
    %3 = tpu.matmul %1, %2, %cst {dimension_numbers = #tpu.dot_dimension_numbers<[1], [0], [0], [1], [0, 0, 1, 1], [], []>} : vector<8x128xbf16>, vector<128x128xbf16>, vector<8x128xf32> -> vector<8x128xf32>
    %c0_3 = arith.constant 0 : index
    %c0_4 = arith.constant 0 : index
    %4 = vector.load %arg3[%c0_3, %c0_4] : memref<1x128xf32, #tpu.memory_space<vmem>>, vector<1x128xf32>
    %5 = vector.broadcast %4 : vector<1x128xf32> to vector<8x128xf32>
    %6 = arith.addf %3, %5 : vector<8x128xf32>
    %c0_5 = arith.constant 0 : index
    %c0_6 = arith.constant 0 : index
    %7 = vector.load %arg4[%c0_5, %c0_6] : memref<8x128xf32, #tpu.memory_space<vmem>>, vector<8x128xf32>
    tpu.vector_store %arg4[%c0_5, %c0_6], %6 {strides = array<i32>} : memref<8x128xf32, #tpu.memory_space<vmem>>, vector<8x128xf32>,
    return
  }
  func.func @transform_0(%arg0: i32) -> (i32, i32) {
    %c0_i32 = arith.constant 0 : i32
    %c0_i32_0 = arith.constant 0 : i32
    return %arg0, %c0_i32 : i32, i32
  }
  func.func @transform_1(%arg0: i32) -> (i32, i32) {
    %c0_i32 = arith.constant 0 : i32
    %c0_i32_0 = arith.constant 0 : i32
    %c0_i32_1 = arith.constant 0 : i32
    return %c0_i32, %c0_i32_0 : i32, i32
  }
  func.func @transform_2(%arg0: i32) -> (i32, i32) {
    %c0_i32 = arith.constant 0 : i32
    %c0_i32_0 = arith.constant 0 : i32
    %c0_i32_1 = arith.constant 0 : i32
    return %c0_i32, %c0_i32_0 : i32, i32
  }
  func.func @transform_3(%arg0: i32) -> (i32, i32) {
    %c0_i32 = arith.constant 0 : i32
    %c0_i32_0 = arith.constant 0 : i32
    return %arg0, %c0_i32 : i32, i32
  }
}

</mosaic_0001>

<bundles_post_ra>
// kernel: tpu_custom_call.1
= control target key start
LH: loop header
LB: loop body
LE: loop exit
PB: predicated region body
PF: predicated region fallthrough
CT: control target
= control target key end

     0   :  { %8 = vsyncpa [#allocation3], 0  ;;  %s330_s0 = inlined_call_operand.hbm [shape: f32[8,128], index: 0, kind: input, shape index: {}]   ;;  %s331_s1 = inlined_call_operand.hbm [shape: bf16[128,128], index: 1, kind: input, shape index: {}]   ;;  %s332_s2 = inlined_call_operand.vmem [shape: f32[1,128], index: 2, kind: input, shape index: {}]   ;;  %s333_s3 = inlined_call_operand.hbm [shape: f32[8,128], index: 3, kind: output, shape index: {}]  }
   0x1   :  { %9 = vsyncpa [#allocation6], 0 }
   0x2   :  { %10 = vsyncpa [#allocation4], 0  ;;  %s291_s12 = smov [#allocation2]   ;;  %s292_s14 = smov [#allocation5]  }
   0x3   :  { %s17_s13 = sshll.u32 %s291_s12, 4  ;;  %s26_s15 = sshll.u32 %s292_s14, 4  ;;  %s18_s13 = int_to_ptr.vmem [resolvable:$true] %s17_s13  ;;  %s27_s15 = int_to_ptr.vmem [resolvable:$true] %s26_s15 }
   0x4   :  { %s233_s16 = scalar_lea.vmem %s18_s13, 128  ;;  %p238_p1 = scmp.lt.s32.totalorder %s18_s13, %s18_s13 }
   0x5   :  { %p234_p0 = scmp.ne.s32.totalorder %s18_s13, %s233_s16  ;;  %p239_p2 = scmp.lt.s32.totalorder %s233_s16, %s233_s16 }
   0x7   :  { %p240_p3 = por %p239_p2, %p238_p1 }
   0x9   :  { %p241_p4 = pnand %p240_p3, %p234_p0 }
   0xb   :  { %244 = shalt.err (!%p241_p4)
}
   0xc   :  { %20 = dma.hbm_to_vmem [thread:$0]  %s330_s0, 128, %s18_s13, [#allocation3]  }
   0xd   :  { %s253_s19 = scalar_lea.vmem %s27_s15, 1024  ;;  %p258_p6 = scmp.lt.s32.totalorder %s27_s15, %s27_s15 }
   0xe   :  { %p254_p5 = scmp.ne.s32.totalorder %s27_s15, %s253_s19  ;;  %p259_p7 = scmp.lt.s32.totalorder %s253_s19, %s253_s19 }
  0x10   :  { %p260_p8 = por %p259_p7, %p258_p6 }
  0x12   :  { %p261_p9 = pnand %p260_p8, %p254_p5 }
  0x14   :  { %264 = shalt.err (!%p261_p9)
}
  0x15   :  { %s293_s20 = smov 64   ;;  %s294_s21 = smov 4  }
  0x16   :  { %32 = dma.hbm_to_vmem [thread:$0]  %s331_s1, 1024, %s27_s15, [#allocation6], %s293_s20, %s293_s20, %s294_s21  }
  0x17   :  { %285 = dma.done.wait [#allocation3], 128  }
  0x18   :  { %286 = vsyncadd [#allocation3], 4294967168 }
  0x19   :  { %287 = dma.done.wait [#allocation6], 1024  }
  0x1a   :  { %288 = vsyncadd [#allocation6], 4294966272  ;;  %v295_v0 = vmov 0.0   ;;  %vm296_vm0 = vmmov 0   ;;  %v217_v1 = vld [vmem:[#allocation5 + $0x38] sm:$0xff]   ;;  %v218_v2 = vld [vmem:[#allocation5 + $0x30] sm:$0xff]  }
  0x1b   :  { %190 = vmatprep.subr.bf16.mxu0 %v295_v0  ;;  %206 = vmatprep.mubr.msk.bf16.mxu0 %vm296_vm0, %v295_v0  ;;  %v219_v3 = vld [vmem:[#allocation5 + $0x28] sm:$0xff]   ;;  %v220_v4 = vld [vmem:[#allocation5 + $0x20] sm:$0xff]   ;;  %v221_v5 = vld [vmem:[#allocation5 + $0x18] sm:$0xff]   ;;  %s297_s24 = smov [#allocation7]  }
  0x1c   :  { %191 = vmatpush3.bf16.msra.mxu0 %v217_v1  ;;  %v222_v6 = vld [vmem:[#allocation5 + $0x10] sm:$0xff]   ;;  %v223_v7 = vld [vmem:[#allocation5 + $0x8] sm:$0xff]   ;;  %v224_v8 = vld [vmem:[#allocation5] sm:$0xff]   ;;  %s162_s25 = sshll.u32 %s297_s24, 4  ;;  %s163_s25 = int_to_ptr.vmem [resolvable:$true] %s162_s25 }
  0x1d   :  { %192 = vmatprep.subr.bf16.mxu0 %v295_v0  ;;  %v42_v9 = vld [vmem:[#allocation2] sm:$0xff]  ;;  %s265_s26 = scalar_lea.vmem %s163_s25, 128  ;;  %p270_p11 = scmp.lt.s32.totalorder %s163_s25, %s163_s25 }
  0x1e   :  { %v43_v10 = vpack.c.bf16 %v42_v9, %v42_v9  ;;  %v172_v11 = vld [vmem:[%s332_s2] ss:$0 sm:$0xff]  ;;  %p266_p10 = scmp.ne.s32.totalorder %s163_s25, %s265_s26  ;;  %p271_p12 = scmp.lt.s32.totalorder %s265_s26, %s265_s26 }
  0x20   :  { %193 = vmatpush3.bf16.msra.mxu0 %v218_v2  ;;  %p272_p13 = por %p271_p12, %p270_p11 }
  0x21   :  { %194 = vmatprep.subr.bf16.mxu0 %v295_v0 }
  0x22   :  { %p273_p0 = pnand %p272_p13, %p266_p10 }
  0x24   :  { %195 = vmatpush3.bf16.msra.mxu0 %v219_v3 }
  0x25   :  { %196 = vmatprep.subr.bf16.mxu0 %v295_v0 }
  0x28   :  { %197 = vmatpush3.bf16.msra.mxu0 %v220_v4 }
  0x29   :  { %198 = vmatprep.subr.bf16.mxu0 %v295_v0 }
  0x2c   :  { %199 = vmatpush3.bf16.msra.mxu0 %v221_v5 }
  0x2d   :  { %200 = vmatprep.subr.bf16.mxu0 %v295_v0 }
  0x30   :  { %201 = vmatpush3.bf16.msra.mxu0 %v222_v6 }
  0x31   :  { %202 = vmatprep.subr.bf16.mxu0 %v295_v0 }
  0x34   :  { %203 = vmatpush3.bf16.msra.mxu0 %v223_v7 }
  0x35   :  { %204 = vmatprep.subr.bf16.mxu0 %v295_v0 }
  0x38   :  { %205 = vmatpush3.bf16.msra.mxu0 %v224_v8 }
  0x3b   :  { %207 = vmatmul.mubr.bf16.vlgmr.msra.gmra.mxu0 %v43_v10 }
  0xfb   :  { %v149_v12 = vpop.f32.mrf.mxu0 }
  0xfc   :  { %v150_v13 = vadd.f32 %v172_v11, %v149_v12 }
  0xfd   :  { %v208_v14 = vpop.f32.mrf.mxu0 }
  0xfe   :  { %155 = vst [vmem:[#allocation7] sm:$0xff] %v150_v13 }
  0xff   :  { %v152_v15 = vpop.f32.mrf.mxu0 }
 0x100   :  { %276 = shalt.err (!%p273_p0)
}
 0x101   :  { %165 = dma.vmem_to_hbm [thread:$0]  %s163_s25, 128, %s333_s3, [#allocation4]   ;;  %v209_v16 = vpop.f32.mrf.mxu0 }
 0x102   :  { %289 = dma.done.wait [#allocation4], 128  }
 0x103   :  { %290 = vsyncadd [#allocation4], 4294967168 }
 0x104   :  { %169 = vsyncpa [#allocation3], 1 }
 0x105   :  { %170 = vsyncpa [#allocation6], 1 }
 0x106   :  { %171 = vsyncpa [#allocation4], 1 }

</bundles_post_ra>
